<compile_context>
chip_gen: v6e
topology: v6e:2x2x1
jax: 0.10.0
libtpu: 0.0.40
codegen_flags: <defaults>
</compile_context>

<pallas_src>
import functools

import numpy as np
import jax
import jax.numpy as jnp
from jax.experimental import pallas as pl
from jax.experimental.pallas import tpu as pltpu


# ----------------------------- config ---------------------------------------
class Cfg:
    vocab_size = 64
    hidden_size = 32
    num_heads = 4
    intermediate_size = 64
    num_layers = 2
    cross_attention_layers = (1,)
    text_hidden_size = 24
    conditioning_dim = 16
    layer_norm_eps = 1e-5
    rope_base = 10000.0


# ----------------------------- in-kernel helpers -----------------------------
def _layernorm(x, g, b, eps):
    mu = jnp.mean(x, axis=-1, keepdims=True)
    var = jnp.mean(jnp.square(x - mu), axis=-1, keepdims=True)
    return (x - mu) * jax.lax.rsqrt(var + eps) * g + b


def _softmax_rows(s):
    m = jnp.max(s, axis=-1, keepdims=True)
    p = jnp.exp(s - m)
    # divide -> EUP reciprocal (separate VLIW slot from the VPU)
    return p * pl.reciprocal(jnp.sum(p, axis=-1, keepdims=True), approx=True)


# ----------------------------- Pallas kernels -------------------------------
def _self_attn_block_kernel(x_ref, g_ref, b_ref, wqkv_ref, wo_ref,
                            mask_ref, cos_ref, ssin_ref, o_ref,
                            *, nh, eps, scale):
    """out = x + OutProj(Attention(RoPE(split(LN(x) @ Wqkv))))   (one batch)."""
    x = x_ref[0]                                   # (S, H)
    H = x.shape[-1]
    D = H // nh
    half = D // 2

    h = _layernorm(x, g_ref[...], b_ref[...], eps)
    qkv = jnp.dot(h, wqkv_ref[...], preferred_element_type=jnp.float32)   # (S, 3H)
    q, k, v = qkv[:, :H], qkv[:, H:2 * H], qkv[:, 2 * H:]

    cos = cos_ref[...]     # (S, D)
    ssin = ssin_ref[...]   # (S, D) -- sin with rotate_half sign pre-folded
    mask = mask_ref[...]   # (S, S)

    outs = []
    for hd in range(nh):                           # static unroll over heads
        lo = hd * D
        qh = q[:, lo:lo + D]
        kh = k[:, lo:lo + D]
        vh = v[:, lo:lo + D]
        # rotate_half(x) == concat([x[half:], x[:half]]) with sign folded into ssin
        qh = qh * cos + jnp.concatenate([qh[:, half:], qh[:, :half]], axis=-1) * ssin
        kh = kh * cos + jnp.concatenate([kh[:, half:], kh[:, :half]], axis=-1) * ssin
        s = jnp.einsum("qd,kd->qk", qh, kh,
                       preferred_element_type=jnp.float32) * scale + mask
        p = _softmax_rows(s)
        outs.append(jnp.dot(p, vh, preferred_element_type=jnp.float32))
    attn = jnp.concatenate(outs, axis=-1)          # (S, H) -- lane-dense
    out = jnp.dot(attn, wo_ref[...], preferred_element_type=jnp.float32)
    o_ref[...] = (x + out)[None]


def _cross_attn_block_kernel(x_ref, enc_ref, g_ref, b_ref, wq_ref, wkv_ref,
                             wo_ref, o_ref, *, nh, eps, scale):
    """out = x + OutProj(Attention(LN(x) Wq, enc Wk, enc Wv))  (no RoPE/mask)."""
    x = x_ref[0]                                   # (S, H)
    enc = enc_ref[0]                               # (Se, T)
    H = x.shape[-1]
    D = H // nh

    h = _layernorm(x, g_ref[...], b_ref[...], eps)
    q = jnp.dot(h, wq_ref[...], preferred_element_type=jnp.float32)       # (S, H)
    kv = jnp.dot(enc, wkv_ref[...], preferred_element_type=jnp.float32)   # (Se, 2H)
    k, v = kv[:, :H], kv[:, H:]

    outs = []
    for hd in range(nh):
        lo = hd * D
        qh, kh, vh = q[:, lo:lo + D], k[:, lo:lo + D], v[:, lo:lo + D]
        s = jnp.einsum("qd,kd->qk", qh, kh,
                       preferred_element_type=jnp.float32) * scale
        p = _softmax_rows(s)
        outs.append(jnp.dot(p, vh, preferred_element_type=jnp.float32))
    attn = jnp.concatenate(outs, axis=-1)
    out = jnp.dot(attn, wo_ref[...], preferred_element_type=jnp.float32)
    o_ref[...] = (x + out)[None]


def _ffn_block_kernel(x_ref, g_ref, b_ref, wgu_ref, wd_ref, o_ref, *, eps, inter):
    """out = x + Down(SiLU(gate) * up) where [gate|up] = LN(x) @ Wgu."""
    x = x_ref[0]                                   # (S, H)
    h = _layernorm(x, g_ref[...], b_ref[...], eps)
    gu = jnp.dot(h, wgu_ref[...], preferred_element_type=jnp.float32)     # (S, 2I)
    gate = gu[:, :inter]
    up = gu[:, inter:]
    act = gate * jax.nn.sigmoid(gate) * up
    out = jnp.dot(act, wd_ref[...], preferred_element_type=jnp.float32)
    o_ref[...] = (x + out)[None]


def _final_kernel(x_ref, g_ref, b_ref, w_ref, hid_ref, logit_ref, *, eps):
    """hidden = LN(x); logits = hidden @ W_lm."""
    x = x_ref[0]
    h = _layernorm(x, g_ref[...], b_ref[...], eps)
    hid_ref[...] = h[None]
    logit_ref[...] = jnp.dot(h, w_ref[...], preferred_element_type=jnp.float32)[None]


def _linear_bias_kernel(x_ref, w_ref, b_ref, o_ref):
    o_ref[...] = (jnp.dot(x_ref[...], w_ref[...],
                          preferred_element_type=jnp.float32) + b_ref[...])


# ----------------------------- wrappers --------------------------------------
def _wspec(shape):
    return pl.BlockSpec(shape, lambda b: tuple(0 for _ in shape))


def self_attn_block(x, g, b, wqkv, wo, mask, cos, ssin, nh, eps):
    B, S, H = x.shape
    D = H // nh
    kern = functools.partial(_self_attn_block_kernel, nh=nh, eps=eps,
                             scale=float(D) ** -0.5)
    return pl.pallas_call(
        kern,
        out_shape=jax.ShapeDtypeStruct((B, S, H), jnp.float32),
        grid=(B,),
        in_specs=[
            pl.BlockSpec((1, S, H), lambda bb: (bb, 0, 0)),
            _wspec((1, H)), _wspec((1, H)),
            _wspec((H, 3 * H)), _wspec((H, H)),
            _wspec((S, S)), _wspec((S, D)), _wspec((S, D)),
        ],
        out_specs=pl.BlockSpec((1, S, H), lambda bb: (bb, 0, 0)),
        compiler_params=pltpu.CompilerParams(dimension_semantics=("parallel",)),
    )(x, g.reshape(1, H), b.reshape(1, H), wqkv, wo, mask, cos, ssin)


def cross_attn_block(x, enc, g, b, wq, wkv, wo, nh, eps):
    B, S, H = x.shape
    Se, T = enc.shape[1], enc.shape[2]
    D = H // nh
    kern = functools.partial(_cross_attn_block_kernel, nh=nh, eps=eps,
                             scale=float(D) ** -0.5)
    return pl.pallas_call(
        kern,
        out_shape=jax.ShapeDtypeStruct((B, S, H), jnp.float32),
        grid=(B,),
        in_specs=[
            pl.BlockSpec((1, S, H), lambda bb: (bb, 0, 0)),
            pl.BlockSpec((1, Se, T), lambda bb: (bb, 0, 0)),
            _wspec((1, H)), _wspec((1, H)),
            _wspec((H, H)), _wspec((T, 2 * H)), _wspec((H, H)),
        ],
        out_specs=pl.BlockSpec((1, S, H), lambda bb: (bb, 0, 0)),
        compiler_params=pltpu.CompilerParams(dimension_semantics=("parallel",)),
    )(x, enc, g.reshape(1, H), b.reshape(1, H), wq, wkv, wo)


def ffn_block(x, g, b, wgu, wd, inter, eps):
    B, S, H = x.shape
    kern = functools.partial(_ffn_block_kernel, eps=eps, inter=inter)
    return pl.pallas_call(
        kern,
        out_shape=jax.ShapeDtypeStruct((B, S, H), jnp.float32),
        grid=(B,),
        in_specs=[
            pl.BlockSpec((1, S, H), lambda bb: (bb, 0, 0)),
            _wspec((1, H)), _wspec((1, H)),
            _wspec((H, 2 * inter)), _wspec((inter, H)),
        ],
        out_specs=pl.BlockSpec((1, S, H), lambda bb: (bb, 0, 0)),
        compiler_params=pltpu.CompilerParams(dimension_semantics=("parallel",)),
    )(x, g.reshape(1, H), b.reshape(1, H), wgu, wd)


def final_block(x, g, b, w_lm, eps):
    B, S, H = x.shape
    V = w_lm.shape[1]
    kern = functools.partial(_final_kernel, eps=eps)
    hidden, logits = pl.pallas_call(
        kern,
        out_shape=(jax.ShapeDtypeStruct((B, S, H), jnp.float32),
                   jax.ShapeDtypeStruct((B, S, V), jnp.float32)),
        grid=(B,),
        in_specs=[
            pl.BlockSpec((1, S, H), lambda bb: (bb, 0, 0)),
            _wspec((1, H)), _wspec((1, H)), _wspec((H, V)),
        ],
        out_specs=(pl.BlockSpec((1, S, H), lambda bb: (bb, 0, 0)),
                   pl.BlockSpec((1, S, V), lambda bb: (bb, 0, 0))),
        compiler_params=pltpu.CompilerParams(dimension_semantics=("parallel",)),
    )(x, g.reshape(1, H), b.reshape(1, H), w_lm)
    return hidden, logits


def cond_proj(x, w, b):
    M = x.shape[0]
    N = w.shape[1]
    return pl.pallas_call(
        _linear_bias_kernel,
        out_shape=jax.ShapeDtypeStruct((M, N), jnp.float32),
    )(x, w, b.reshape(1, N))


# ----------------------------- parameters -----------------------------------
def init_params(key, cfg):
    H, I, T, V = (cfg.hidden_size, cfg.intermediate_size,
                  cfg.text_hidden_size, cfg.vocab_size)
    keys = iter(jax.random.split(key, 128))

    def lin(in_f, out_f):
        return jax.random.normal(next(keys), (in_f, out_f), jnp.float32) * 0.02

    ones = jnp.ones((H,), jnp.float32)
    zeros = jnp.zeros((H,), jnp.float32)

    params = {
        "embed": jax.random.normal(next(keys), (V, H), jnp.float32) * 0.02,
        "cond_w": lin(cfg.conditioning_dim, H),
        "cond_b": jnp.zeros((H,), jnp.float32),
        "lnf_g": ones, "lnf_b": zeros,
        "lm_head": lin(H, V),
        "layers": [],
    }
    for li in range(cfg.num_layers):
        p = {
            "ln1_g": ones, "ln1_b": zeros,
            "sa_q": lin(H, H), "sa_k": lin(H, H),
            "sa_v": lin(H, H), "sa_o": lin(H, H),
            "ln2_g": ones, "ln2_b": zeros,
            "wg": lin(H, I), "wu": lin(H, I), "wd": lin(I, H),
        }
        if li in cfg.cross_attention_layers:
            p.update({
                "lnc_g": ones, "lnc_b": zeros,
                "ca_q": lin(H, H), "ca_k": lin(T, H),
                "ca_v": lin(T, H), "ca_o": lin(H, H),
            })
        params["layers"].append(p)
    return params


# ----------------------------- forward (Pallas) ------------------------------
def musicgen_forward(params, input_ids, encoder_hidden_states, conditioning, cfg):
    B, S = input_ids.shape
    H, nh = cfg.hidden_size, cfg.num_heads
    D = H // nh
    I = cfg.intermediate_size
    eps = cfg.layer_norm_eps

    # embeddings + conditioning added at position 0
    x = jnp.take(params["embed"], input_ids, axis=0)                   # (B, S, H)
    cond = cond_proj(conditioning, params["cond_w"], params["cond_b"])  # (B, H)
    x = x.at[:, 0, :].add(cond)

    # causal additive mask
    causal = jnp.tril(jnp.ones((S, S), jnp.float32))
    mask = (1.0 - causal) * -10000.0

    # RoPE tables (sign folded into sin for the in-kernel rotate_half trick)
    inv_freq = 1.0 / (cfg.rope_base ** (jnp.arange(0, D, 2, dtype=jnp.float32) / D))
    freqs = jnp.outer(jnp.arange(S, dtype=jnp.float32), inv_freq)
    emb = jnp.concatenate([freqs, freqs], axis=-1)
    cos = jnp.cos(emb)
    sign = jnp.concatenate([-jnp.ones(D // 2), jnp.ones(D // 2)]).astype(jnp.float32)
    ssin = jnp.sin(emb) * sign[None, :]

    for p in params["layers"]:
        # fused QKV / KV / gate-up weights (in production these would be pre-fused)
        wqkv = jnp.concatenate([p["sa_q"], p["sa_k"], p["sa_v"]], axis=1)   # (H, 3H)
        x = self_attn_block(x, p["ln1_g"], p["ln1_b"], wqkv, p["sa_o"],
                            mask, cos, ssin, nh, eps)
        if "ca_q" in p:
            wkv = jnp.concatenate([p["ca_k"], p["ca_v"]], axis=1)           # (T, 2H)
            x = cross_attn_block(x, encoder_hidden_states, p["lnc_g"], p["lnc_b"],
                                 p["ca_q"], wkv, p["ca_o"], nh, eps)
        wgu = jnp.concatenate([p["wg"], p["wu"]], axis=1)                   # (H, 2I)
        x = ffn_block(x, p["ln2_g"], p["ln2_b"], wgu, p["wd"], I, eps)

    hidden, logits = final_block(x, params["lnf_g"], params["lnf_b"],
                                 params["lm_head"], eps)
    return {"logits": logits, "hidden_states": hidden}


# ----------------------------- pure-JAX reference ----------------------------
def _rotate_half(x):
    d = x.shape[-1] // 2
    return jnp.concatenate([-x[..., d:], x[..., :d]], axis=-1)


def reference_forward(params, input_ids, enc, conditioning, cfg):
    B, S = input_ids.shape
    H, nh = cfg.hidden_size, cfg.num_heads
    D = H // nh
    eps = cfg.layer_norm_eps

    def ln(x, g, b):
        m = jnp.mean(x, axis=-1, keepdims=True)
        v = jnp.mean(jnp.square(x - m), axis=-1, keepdims=True)
        return (x - m) / jnp.sqrt(v + eps) * g + b

    def mha(x, kv, wq, wk, wv, wo, mask, cos, sin, use_rope):
        Sq, Sk = x.shape[1], kv.shape[1]
        q = (x @ wq).reshape(B, Sq, nh, D).transpose(0, 2, 1, 3)
        k = (kv @ wk).reshape(B, Sk, nh, D).transpose(0, 2, 1, 3)
        v = (kv @ wv).reshape(B, Sk, nh, D).transpose(0, 2, 1, 3)
        if use_rope:
            q = q * cos + _rotate_half(q) * sin
            k = k * cos + _rotate_half(k) * sin
        s = jnp.einsum("bhqd,bhkd->bhqk", q, k) * (D ** -0.5)
        s = s + mask[None, None]
        a = jax.nn.softmax(s, axis=-1)
        o = jnp.einsum("bhqk,bhkd->bhqd", a, v)
        return o.transpose(0, 2, 1, 3).reshape(B, Sq, H) @ wo

    x = jnp.take(params["embed"], input_ids, axis=0)
    x = x.at[:, 0, :].add(conditioning @ params["cond_w"] + params["cond_b"])
    causal = jnp.tril(jnp.ones((S, S), jnp.float32))
    mask = (1.0 - causal) * -10000.0
    enc_mask = jnp.zeros((S, enc.shape[1]), jnp.float32)

    inv_freq = 1.0 / (cfg.rope_base ** (jnp.arange(0, D, 2, dtype=jnp.float32) / D))
    freqs = jnp.outer(jnp.arange(S, dtype=jnp.float32), inv_freq)
    embt = jnp.concatenate([freqs, freqs], axis=-1)
    cos, sin = jnp.cos(embt), jnp.sin(embt)

    for p in params["layers"]:
        res = x
        h = ln(x, p["ln1_g"], p["ln1_b"])
        x = res + mha(h, h, p["sa_q"], p["sa_k"], p["sa_v"], p["sa_o"], mask, cos, sin, True)
        if "ca_q" in p:
            res = x
            h = ln(x, p["lnc_g"], p["lnc_b"])
            x = res + mha(h, enc, p["ca_q"], p["ca_k"], p["ca_v"], p["ca_o"],
                          enc_mask, cos, sin, False)
        res = x
        h = ln(x, p["ln2_g"], p["ln2_b"])
        gate = h @ p["wg"]
        inter = gate * jax.nn.sigmoid(gate) * (h @ p["wu"])
        x = res + inter @ p["wd"]

    hidden = ln(x, params["lnf_g"], params["lnf_b"])
    return {"logits": hidden @ params["lm_head"], "hidden_states": hidden}


# ----------------------------- main ------------------------------------------
if __name__ == "__main__":
    cfg = Cfg()
    key = jax.random.PRNGKey(0)
    kp, ki, ke, kc = jax.random.split(key, 4)

    params = init_params(kp, cfg)

    B, S, S_enc = 2, 8, 8
    input_ids = jax.random.randint(ki, (B, S), 0, cfg.vocab_size)
    encoder_hidden_states = jax.random.normal(ke, (B, S_enc, cfg.text_hidden_size), jnp.float32)
    conditioning = jax.random.normal(kc, (B, cfg.conditioning_dim), jnp.float32)

    out = musicgen_forward(params, input_ids, encoder_hidden_states, conditioning, cfg)
    logits = jax.block_until_ready(out["logits"])

    ref = reference_forward(params, input_ids, encoder_hidden_states, conditioning, cfg)
    np.testing.assert_allclose(np.asarray(logits), np.asarray(ref["logits"]),
                               atol=1e-2, rtol=1e-2)
    np.testing.assert_allclose(np.asarray(out["hidden_states"]),
                               np.asarray(ref["hidden_states"]),
                               atol=1e-2, rtol=1e-2)
    assert logits.shape == (B, S, cfg.vocab_size)
    assert out["hidden_states"].shape == (B, S, cfg.hidden_size)

    print("KERNEL_OK")
</pallas_src>

<mosaic_0001>
module attributes {stable_mosaic.version = 11 : i64} {
  func.func @_linear_bias_kernel(%arg0: memref<2x16xf32, #tpu.memory_space<vmem>>, %arg1: memref<16x32xf32, #tpu.memory_space<vmem>>, %arg2: memref<1x32xf32, #tpu.memory_space<vmem>>, %arg3: memref<2x32xf32, #tpu.memory_space<vmem>>) attributes {dimension_semantics = [], scalar_prefetch = 0 : i64, scratch_operands = 0 : i64, tpu.core_type = #tpu.core_type<tc>} {
    %c0 = arith.constant 0 : index
    %c0_0 = arith.constant 0 : index
    %0 = vector.load %arg0[%c0, %c0_0] : memref<2x16xf32, #tpu.memory_space<vmem>>, vector<2x16xf32>
    %c0_1 = arith.constant 0 : index
    %c0_2 = arith.constant 0 : index
    %1 = vector.load %arg1[%c0_1, %c0_2] : memref<16x32xf32, #tpu.memory_space<vmem>>, vector<16x32xf32>
    %cst = arith.constant dense<0.000000e+00> : vector<2x32xf32>
    %2 = tpu.matmul %0, %1, %cst {dimension_numbers = #tpu.dot_dimension_numbers<[1], [0], [0], [1], [0, 0, 1, 1], [], []>} : vector<2x16xf32>, vector<16x32xf32>, vector<2x32xf32> -> vector<2x32xf32>
    %c0_3 = arith.constant 0 : index
    %c0_4 = arith.constant 0 : index
    %3 = vector.load %arg2[%c0_3, %c0_4] : memref<1x32xf32, #tpu.memory_space<vmem>>, vector<1x32xf32>
    %4 = vector.broadcast %3 : vector<1x32xf32> to vector<2x32xf32>
    %5 = arith.addf %2, %4 : vector<2x32xf32>
    %c0_5 = arith.constant 0 : index
    %c0_6 = arith.constant 0 : index
    %6 = vector.load %arg3[%c0_5, %c0_6] : memref<2x32xf32, #tpu.memory_space<vmem>>, vector<2x32xf32>
    tpu.vector_store %arg3[%c0_5, %c0_6], %5 {strides = array<i32>} : memref<2x32xf32, #tpu.memory_space<vmem>>, vector<2x32xf32>,
    return
  }
}

</mosaic_0001>

<bundles_post_ra>
// kernel: tpu_custom_call.1
= control target key start
LH: loop header
LB: loop body
LE: loop exit
PB: predicated region body
PF: predicated region fallthrough
CT: control target
= control target key end

     0   :  { %8 = vsyncpa [#allocation3], 0  ;;  %s267_s0 = inlined_call_operand.hbm [shape: f32[2,16], index: 0, kind: input, shape index: {}]   ;;  %s268_s1 = inlined_call_operand.hbm [shape: f32[16,32], index: 1, kind: input, shape index: {}]   ;;  %s269_s2 = inlined_call_operand.vmem [shape: f32[1,32], index: 2, kind: input, shape index: {}]   ;;  %s270_s3 = inlined_call_operand.hbm [shape: f32[2,32], index: 3, kind: output, shape index: {}]  }
   0x1   :  { %9 = vsyncpa [#allocation6], 0 }
   0x2   :  { %10 = vsyncpa [#allocation4], 0  ;;  %s228_s12 = smov [#allocation2]   ;;  %s229_s14 = smov [#allocation5]  }
   0x3   :  { %s17_s13 = sshll.u32 %s228_s12, 4  ;;  %s26_s15 = sshll.u32 %s229_s14, 4  ;;  %s18_s13 = int_to_ptr.vmem [resolvable:$true] %s17_s13  ;;  %s27_s15 = int_to_ptr.vmem [resolvable:$true] %s26_s15 }
   0x4   :  { %s170_s16 = scalar_lea.vmem %s18_s13, 32  ;;  %p175_p1 = scmp.lt.s32.totalorder %s18_s13, %s18_s13 }
   0x5   :  { %p171_p0 = scmp.ne.s32.totalorder %s18_s13, %s170_s16  ;;  %p176_p2 = scmp.lt.s32.totalorder %s170_s16, %s170_s16 }
   0x7   :  { %p177_p3 = por %p176_p2, %p175_p1 }
   0x9   :  { %p178_p4 = pnand %p177_p3, %p171_p0 }
   0xb   :  { %181 = shalt.err (!%p178_p4)
}
   0xc   :  { %20 = dma.hbm_to_vmem [thread:$0]  %s267_s0, 32, %s18_s13, [#allocation3]  }
   0xd   :  { %s190_s19 = scalar_lea.vmem %s27_s15, 256  ;;  %p195_p6 = scmp.lt.s32.totalorder %s27_s15, %s27_s15 }
   0xe   :  { %p191_p5 = scmp.ne.s32.totalorder %s27_s15, %s190_s19  ;;  %p196_p7 = scmp.lt.s32.totalorder %s190_s19, %s190_s19 }
  0x10   :  { %p197_p8 = por %p196_p7, %p195_p6 }
  0x12   :  { %p198_p9 = pnand %p197_p8, %p191_p5 }
  0x14   :  { %201 = shalt.err (!%p198_p9)
}
  0x15   :  { %s230_s20 = smov 128   ;;  %s231_s21 = smov 8  }
  0x16   :  { %32 = dma.hbm_to_vmem [thread:$0]  %s268_s1, 256, %s27_s15, [#allocation6], %s230_s20, %s230_s20, %s231_s21  }
  0x17   :  { %222 = dma.done.wait [#allocation3], 32  }
  0x18   :  { %223 = vsyncadd [#allocation3], 4294967264 }
  0x19   :  { %224 = dma.done.wait [#allocation6], 256  }
  0x1a   :  { %225 = vsyncadd [#allocation6], 4294967040  ;;  %v232_v0 = vmov 0.0   ;;  %vm233_vm0 = vmmov 0   ;;  %v43_v1 = vld [vmem:[#allocation5 + $0x8] sm:$0xff]  ;;  %v42_v2 = vld [vmem:[#allocation5] sm:$0xff] }
  0x1b   :  { %148 = vmatprep.subr.mxu0 %v232_v0  ;;  %152 = vmatprep.mubr.msk.f32.mxu0 %vm233_vm0, %v232_v0  ;;  %v41_v3 = vld [vmem:[#allocation2] sm:$0x3]  ;;  %vm51_vm1 = vcmask 130048   ;;  %s234_s1 = smov [#allocation7]   ;;  %vm125_vm2 = vcmask 254976  }
  0x1c   :  { %149 = vmatpush3.msra.mxu0 %v43_v1  ;;  %v143_v4 = vld [vmem:[%s269_s2] ss:$0 sm:$0xff]  ;;  %s133_s25 = sshll.u32 %s234_s1, 4  ;;  %s134_s25 = int_to_ptr.vmem [resolvable:$true] %s133_s25 }
  0x1d   :  { %150 = vmatprep.subr.mxu0 %v232_v0  ;;  %s202_s26 = scalar_lea.vmem %s134_s25, 32  ;;  %p207_p11 = scmp.lt.s32.totalorder %s134_s25, %s134_s25 }
  0x1e   :  { %151 = vmatpush3.msra.mxu0 %v42_v2  ;;  %p203_p10 = scmp.ne.s32.totalorder %s134_s25, %s202_s26  ;;  %p208_p12 = scmp.lt.s32.totalorder %s202_s26, %s202_s26 }
  0x1f   :  { %153 = vmatmul.mubr.msk.f32.vlgmr.msra.gmra.mxu0 %vm51_vm1, %v41_v3 }
  0x20   :  { %p209_p13 = por %p208_p12, %p207_p11 }
  0x22   :  { %p210_p0 = pnand %p209_p13, %p203_p10 }
  0xdf   :  { %v121_v5 = vpop.f32.mrf.mxu0 }
  0xe0   :  { %v122_v6 = vadd.f32 %v143_v4, %v121_v5 }
  0xe1   :  { %v154_v7 = vpop.f32.mrf.mxu0 }
  0xe2   :  { %126 = vst.msk [vmem:[#allocation7] sm:$0x3] %vm125_vm2, %v122_v6 }
  0xe3   :  { %213 = shalt.err (!%p210_p0)
}
  0xe4   :  { %136 = dma.vmem_to_hbm [thread:$0]  %s134_s25, 32, %s270_s3, [#allocation4]  }
  0xe5   :  { %226 = dma.done.wait [#allocation4], 32  }
  0xe6   :  { %227 = vsyncadd [#allocation4], 4294967264 }
  0xe7   :  { %140 = vsyncpa [#allocation3], 1 }
  0xe8   :  { %141 = vsyncpa [#allocation6], 1 }
  0xe9   :  { %142 = vsyncpa [#allocation4], 1 }

</bundles_post_ra>
